<compile_context>
chip_gen: v7x
topology: tpu7x:2x2x1
jax: 0.10.0
libtpu: 0.0.40
codegen_flags: <defaults>
</compile_context>

<pallas_src>
import functools
import math

import jax
import jax.numpy as jnp
from jax.experimental import pallas as pl
from jax.experimental.pallas import tpu as pltpu


def _round_up(x, m):
    return ((x + m - 1) // m) * m


def _mlp_kernel(x_ref, w1_ref, b1_ref, w2_ref, b2_ref, w3_ref, b3_ref, o_ref):
    """Fused 3-layer MLP on one batch tile:
    relu(x@W1+b1) -> relu(@W2+b2) -> @W3+b3 (MXU in bf16, f32 accumulation)."""
    # x arrives as the original (tb, 63) f32 rows; cast to MXU dtype in VMEM.
    x = x_ref[...].astype(w1_ref.dtype)

    # fc1 + ReLU (f32 accumulation; bias add / ReLU stay f32)
    h1 = jnp.dot(x, w1_ref[...], preferred_element_type=jnp.float32) + b1_ref[...]
    h1 = jnp.maximum(h1, 0.0)

    # fc2 + ReLU
    h2 = jnp.dot(h1.astype(w2_ref.dtype), w2_ref[...],
                 preferred_element_type=jnp.float32) + b2_ref[...]
    h2 = jnp.maximum(h2, 0.0)

    # fc3 (no activation); true-width (tb, 24) store
    out = jnp.dot(h2.astype(w3_ref.dtype), w3_ref[...],
                  preferred_element_type=jnp.float32) + b3_ref[...]
    o_ref[...] = out.astype(o_ref.dtype)


@functools.partial(jax.jit, static_argnames=("block_batch", "compute_dtype"))
def hand_gesture_mlp(x, w1, b1, w2, b2, w3, b3, *, block_batch=1024,
                     compute_dtype=jnp.bfloat16):
    """Fused MLP forward. x: (batch, 63) f32. Returns (batch, 24) f32."""
    batch, in_features = x.shape
    hidden = w1.shape[1]
    num_classes = w3.shape[1]
    f32 = jnp.float32

    # ---- batch tile selection (no zero-filled batch padding) ---------------
    if batch < 8:
        tb = batch                      # block dim == full array dim: legal
    else:
        num_tiles = pl.cdiv(batch, block_batch)
        if batch >= 16:
            num_tiles = max(num_tiles, 2)       # feed both v7x TensorCores
            if num_tiles % 2:
                num_tiles += 1                  # even split across cores
        tb = min(_round_up(pl.cdiv(batch, num_tiles), 8), _round_up(batch, 8))
    grid = (pl.cdiv(batch, tb),)        # partial final block masked by Pallas

    # ---- operands: x stays f32 & unpadded; tiny weights cast once to bf16 --
    w1c, w2c, w3c = (w.astype(compute_dtype) for w in (w1, w2, w3))
    b1c, b2c, b3c = (b.astype(f32) for b in (b1, b2, b3))

    # Advisory cost estimate with true (unpadded) traffic.
    flops = 2 * batch * (in_features * hidden + hidden * hidden
                         + hidden * num_classes)
    w_itemsize = jnp.dtype(compute_dtype).itemsize
    bytes_accessed = (
        batch * in_features * x.dtype.itemsize                        # x read
        + (in_features * hidden + hidden * hidden + hidden * num_classes)
        * w_itemsize                                                  # weights
        + (2 * hidden + num_classes) * 4                              # biases
        + batch * num_classes * 4)                                    # out write

    return pl.pallas_call(
        _mlp_kernel,
        out_shape=jax.ShapeDtypeStruct((batch, num_classes), f32),
        grid=grid,
        in_specs=[
            pl.BlockSpec((tb, in_features), lambda i: (i, 0)),       # x tile
            pl.BlockSpec((in_features, hidden), lambda i: (0, 0)),   # W1 (resident)
            pl.BlockSpec((1, hidden), lambda i: (0, 0)),             # b1
            pl.BlockSpec((hidden, hidden), lambda i: (0, 0)),        # W2 (resident)
            pl.BlockSpec((1, hidden), lambda i: (0, 0)),             # b2
            pl.BlockSpec((hidden, num_classes), lambda i: (0, 0)),   # W3 (resident)
            pl.BlockSpec((1, num_classes), lambda i: (0, 0)),        # b3
        ],
        out_specs=pl.BlockSpec((tb, num_classes), lambda i: (i, 0)),
        compiler_params=pltpu.CompilerParams(
            dimension_semantics=("parallel",)),
        cost_estimate=pl.CostEstimate(
            flops=flops, transcendentals=0, bytes_accessed=int(bytes_accessed)),
    )(x, w1c, b1c, w2c, b2c, w3c, b3c)


def init_params(key, input_size=63, hidden_size=128, num_classes=24,
                dtype=jnp.float32):
    """Deterministic init mimicking nn.Linear's default:
    U(-1/sqrt(fan_in), 1/sqrt(fan_in)). Weights stored as (in, out)."""
    ks = jax.random.split(key, 6)

    def linear(kw, kb, fan_in, fan_out):
        bound = 1.0 / math.sqrt(fan_in)
        w = jax.random.uniform(kw, (fan_in, fan_out), dtype, -bound, bound)
        b = jax.random.uniform(kb, (1, fan_out), dtype, -bound, bound)
        return w, b

    w1, b1 = linear(ks[0], ks[1], input_size, hidden_size)
    w2, b2 = linear(ks[2], ks[3], hidden_size, hidden_size)
    w3, b3 = linear(ks[4], ks[5], hidden_size, num_classes)
    return w1, b1, w2, b2, w3, b3


def reference_mlp(x, w1, b1, w2, b2, w3, b3, compute_dtype=jnp.bfloat16):
    """Plain-JAX reference using the same bf16-in / f32-accumulate recipe."""
    cd = compute_dtype
    f32 = jnp.float32
    h1 = jnp.maximum(
        jnp.dot(x.astype(cd), w1.astype(cd), preferred_element_type=f32)
        + b1.astype(f32), 0.0)
    h2 = jnp.maximum(
        jnp.dot(h1.astype(cd), w2.astype(cd), preferred_element_type=f32)
        + b2.astype(f32), 0.0)
    return (jnp.dot(h2.astype(cd), w3.astype(cd), preferred_element_type=f32)
            + b3.astype(f32))


if __name__ == "__main__":
    key = jax.random.PRNGKey(0)
    k_x1, k_x2, k_x3, k_p = jax.random.split(key, 4)

    input_size, hidden_size, num_classes = 63, 128, 24
    params = init_params(k_p, input_size, hidden_size, num_classes)

    def check(x, name, **kw):
        out = jax.block_until_ready(hand_gesture_mlp(x, *params, **kw))
        ref = reference_mlp(x, *params)
        assert out.shape == ref.shape, (name, out.shape, ref.shape)
        assert jnp.allclose(out, ref, atol=1e-3, rtol=1e-3), \
            f"{name} mismatch vs. JAX reference"

    # Tiny batch: single block whose dims equal the full array dims.
    check(jax.random.normal(k_x1, (2, input_size), jnp.float32), "batch=2")

    # Small deployment-style batch: one 8-row tile, grid of 1.
    check(jax.random.normal(k_x2, (8, input_size), jnp.float32), "batch=8")

    # Ragged batch: exercises the even 2-step grid (tb=152) and the masked
    # partial final block (300 = 152 + 148 valid + 4 masked rows).
    x_big = jax.random.normal(k_x3, (300, input_size), jnp.float32)
    check(x_big, "batch=300 grid=2")

    # Same batch with a smaller tile cap: 4-step grid, 20 masked tail rows.
    check(x_big, "batch=300 grid=4", block_batch=128)

    print("KERNEL_OK")
</pallas_src>

<mosaic_0001>
module attributes {stable_mosaic.version = 11 : i64} {
  func.func @_mlp_kernel(%arg0: i32, %arg1: memref<2x63xf32, #tpu.memory_space<vmem>>, %arg2: memref<63x128xbf16, #tpu.memory_space<vmem>>, %arg3: memref<1x128xf32, #tpu.memory_space<vmem>>, %arg4: memref<128x128xbf16, #tpu.memory_space<vmem>>, %arg5: memref<1x128xf32, #tpu.memory_space<vmem>>, %arg6: memref<128x24xbf16, #tpu.memory_space<vmem>>, %arg7: memref<1x24xf32, #tpu.memory_space<vmem>>, %arg8: memref<2x24xf32, #tpu.memory_space<vmem>>) attributes {dimension_semantics = [#tpu.dimension_semantics<parallel>], iteration_bounds = array<i64: 1>, scalar_prefetch = 0 : i64, scratch_operands = 0 : i64, tpu.core_type = #tpu.core_type<tc>, window_params = [{transform_indices = @transform_0, window_bounds = array<i64: 2, 63>}, {pipeline_mode = #tpu.pipeline_mode<synchronous>, transform_indices = @transform_1, window_bounds = array<i64: 63, 128>}, {pipeline_mode = #tpu.pipeline_mode<synchronous>, transform_indices = @transform_2, window_bounds = array<i64: 1, 128>}, {pipeline_mode = #tpu.pipeline_mode<synchronous>, transform_indices = @transform_3, window_bounds = array<i64: 128, 128>}, {pipeline_mode = #tpu.pipeline_mode<synchronous>, transform_indices = @transform_4, window_bounds = array<i64: 1, 128>}, {pipeline_mode = #tpu.pipeline_mode<synchronous>, transform_indices = @transform_5, window_bounds = array<i64: 128, 24>}, {pipeline_mode = #tpu.pipeline_mode<synchronous>, transform_indices = @transform_6, window_bounds = array<i64: 1, 24>}, {transform_indices = @transform_7, window_bounds = array<i64: 2, 24>}]} {
    %c0 = arith.constant 0 : index
    %c0_0 = arith.constant 0 : index
    %0 = vector.load %arg1[%c0, %c0_0] : memref<2x63xf32, #tpu.memory_space<vmem>>, vector<2x63xf32>
    %1 = arith.truncf %0 : vector<2x63xf32> to vector<2x63xbf16>
    %c0_1 = arith.constant 0 : index
    %c0_2 = arith.constant 0 : index
    %2 = vector.load %arg2[%c0_1, %c0_2] : memref<63x128xbf16, #tpu.memory_space<vmem>>, vector<63x128xbf16>
    %cst = arith.constant dense<0.000000e+00> : vector<2x128xf32>
    %3 = tpu.matmul %1, %2, %cst {dimension_numbers = #tpu.dot_dimension_numbers<[1], [0], [0], [1], [0, 0, 1, 1], [], []>} : vector<2x63xbf16>, vector<63x128xbf16>, vector<2x128xf32> -> vector<2x128xf32>
    %c0_3 = arith.constant 0 : index
    %c0_4 = arith.constant 0 : index
    %4 = vector.load %arg3[%c0_3, %c0_4] : memref<1x128xf32, #tpu.memory_space<vmem>>, vector<1x128xf32>
    %5 = vector.broadcast %4 : vector<1x128xf32> to vector<2x128xf32>
    %6 = arith.addf %3, %5 : vector<2x128xf32>
    %cst_5 = arith.constant 0.000000e+00 : f32
    %7 = vector.broadcast %cst_5 : f32 to vector<2x128xf32>
    %8 = arith.maximumf %6, %7 : vector<2x128xf32>
    %9 = arith.truncf %8 : vector<2x128xf32> to vector<2x128xbf16>
    %c0_6 = arith.constant 0 : index
    %c0_7 = arith.constant 0 : index
    %10 = vector.load %arg4[%c0_6, %c0_7] : memref<128x128xbf16, #tpu.memory_space<vmem>>, vector<128x128xbf16>
    %cst_8 = arith.constant dense<0.000000e+00> : vector<2x128xf32>
    %11 = tpu.matmul %9, %10, %cst_8 {dimension_numbers = #tpu.dot_dimension_numbers<[1], [0], [0], [1], [0, 0, 1, 1], [], []>} : vector<2x128xbf16>, vector<128x128xbf16>, vector<2x128xf32> -> vector<2x128xf32>
    %c0_9 = arith.constant 0 : index
    %c0_10 = arith.constant 0 : index
    %12 = vector.load %arg5[%c0_9, %c0_10] : memref<1x128xf32, #tpu.memory_space<vmem>>, vector<1x128xf32>
    %13 = vector.broadcast %12 : vector<1x128xf32> to vector<2x128xf32>
    %14 = arith.addf %11, %13 : vector<2x128xf32>
    %cst_11 = arith.constant 0.000000e+00 : f32
    %15 = vector.broadcast %cst_11 : f32 to vector<2x128xf32>
    %16 = arith.maximumf %14, %15 : vector<2x128xf32>
    %17 = arith.truncf %16 : vector<2x128xf32> to vector<2x128xbf16>
    %c0_12 = arith.constant 0 : index
    %c0_13 = arith.constant 0 : index
    %18 = vector.load %arg6[%c0_12, %c0_13] : memref<128x24xbf16, #tpu.memory_space<vmem>>, vector<128x24xbf16>
    %cst_14 = arith.constant dense<0.000000e+00> : vector<2x24xf32>
    %19 = tpu.matmul %17, %18, %cst_14 {dimension_numbers = #tpu.dot_dimension_numbers<[1], [0], [0], [1], [0, 0, 1, 1], [], []>} : vector<2x128xbf16>, vector<128x24xbf16>, vector<2x24xf32> -> vector<2x24xf32>
    %c0_15 = arith.constant 0 : index
    %c0_16 = arith.constant 0 : index
    %20 = vector.load %arg7[%c0_15, %c0_16] : memref<1x24xf32, #tpu.memory_space<vmem>>, vector<1x24xf32>
    %21 = vector.broadcast %20 : vector<1x24xf32> to vector<2x24xf32>
    %22 = arith.addf %19, %21 : vector<2x24xf32>
    %c0_17 = arith.constant 0 : index
    %c0_18 = arith.constant 0 : index
    %23 = vector.load %arg8[%c0_17, %c0_18] : memref<2x24xf32, #tpu.memory_space<vmem>>, vector<2x24xf32>
    tpu.vector_store %arg8[%c0_17, %c0_18], %22 {strides = array<i32>} : memref<2x24xf32, #tpu.memory_space<vmem>>, vector<2x24xf32>,
    return
  }
  func.func @transform_0(%arg0: i32) -> (i32, i32) {
    %c0_i32 = arith.constant 0 : i32
    %c0_i32_0 = arith.constant 0 : i32
    return %arg0, %c0_i32 : i32, i32
  }
  func.func @transform_1(%arg0: i32) -> (i32, i32) {
    %c0_i32 = arith.constant 0 : i32
    %c0_i32_0 = arith.constant 0 : i32
    %c0_i32_1 = arith.constant 0 : i32
    return %c0_i32, %c0_i32_0 : i32, i32
  }
  func.func @transform_2(%arg0: i32) -> (i32, i32) {
    %c0_i32 = arith.constant 0 : i32
    %c0_i32_0 = arith.constant 0 : i32
    %c0_i32_1 = arith.constant 0 : i32
    return %c0_i32, %c0_i32_0 : i32, i32
  }
  func.func @transform_3(%arg0: i32) -> (i32, i32) {
    %c0_i32 = arith.constant 0 : i32
    %c0_i32_0 = arith.constant 0 : i32
    %c0_i32_1 = arith.constant 0 : i32
    return %c0_i32, %c0_i32_0 : i32, i32
  }
  func.func @transform_4(%arg0: i32) -> (i32, i32) {
    %c0_i32 = arith.constant 0 : i32
    %c0_i32_0 = arith.constant 0 : i32
    %c0_i32_1 = arith.constant 0 : i32
    return %c0_i32, %c0_i32_0 : i32, i32
  }
  func.func @transform_5(%arg0: i32) -> (i32, i32) {
    %c0_i32 = arith.constant 0 : i32
    %c0_i32_0 = arith.constant 0 : i32
    %c0_i32_1 = arith.constant 0 : i32
    return %c0_i32, %c0_i32_0 : i32, i32
  }
  func.func @transform_6(%arg0: i32) -> (i32, i32) {
    %c0_i32 = arith.constant 0 : i32
    %c0_i32_0 = arith.constant 0 : i32
    %c0_i32_1 = arith.constant 0 : i32
    return %c0_i32, %c0_i32_0 : i32, i32
  }
  func.func @transform_7(%arg0: i32) -> (i32, i32) {
    %c0_i32 = arith.constant 0 : i32
    %c0_i32_0 = arith.constant 0 : i32
    return %arg0, %c0_i32 : i32, i32
  }
}

</mosaic_0001>

<bundles_post_ra>
// kernel: hand_gesture_mlp.1
= control target key start
LH: loop header
LB: loop body
LE: loop exit
PB: predicated region body
PF: predicated region fallthrough
CT: control target
= control target key end

     0   :  { %v508_v1 = vmov 0.0   ;;  %vm72_vm0 = vcmask 1046528   ;;  %vm73_vm1 = vcmask 1047552   ;;  %v509_v5 = vmov 65535   ;;  %s662_s0 = inlined_call_operand.vmem [shape: f32[2,63], index: 0, kind: input, shape index: {}]   ;;  %s663_s1 = inlined_call_operand.vmem [shape: bf16[63,128], index: 1, kind: input, shape index: {}]   ;;  %s664_s2 = inlined_call_operand.vmem [shape: f32[1,128], index: 2, kind: input, shape index: {}]   ;;  %s665_s3 = inlined_call_operand.vmem [shape: bf16[128,128], index: 3, kind: input, shape index: {}]   ;;  %s666_s4 = inlined_call_operand.vmem [shape: f32[1,128], index: 4, kind: input, shape index: {}]   ;;  %s667_s5 = inlined_call_operand.vmem [shape: bf16[128,24], index: 5, kind: input, shape index: {}]   ;;  %s668_s6 = inlined_call_operand.vmem [shape: f32[1,24], index: 6, kind: input, shape index: {}]   ;;  %s669_s7 = inlined_call_operand.hbm [shape: f32[2,24], index: 7, kind: output, shape index: {}]  }
   0x1   :  { %v464_v0 = vld [vmem:[%s663_s1] sm:$0xff]   ;;  %408 = vmatprep.subr.bf16.mxu0 %v508_v1  ;;  %420 = vmatprep.subr.bf16.mxu1 %v508_v1  ;;  %v465_v2 = vld [vmem:[%s663_s1 + $0x8] sm:$0xff]   ;;  %v466_v3 = vld [vmem:[%s663_s1 + $0x10] sm:$0xff]   ;;  %v74_v6 = vsel %vm72_vm0, 4294967295, %v509_v5  ;;  %vm510_vm2 = vmmov 0   ;;  %vm68_vm3 = vcmask 515072  }
   0x2   :  { %409 = vmatpush3.bf16.msra.mxu0 %v464_v0  ;;  %v467_v4 = vld [vmem:[%s663_s1 + $0x18] sm:$0xff]   ;;  %v468_v7 = vld [vmem:[%s665_s3] sm:$0xff]   ;;  %416 = vmatprep.mubr.msk.bf16.mxu0 %vm510_vm2, %v508_v1  ;;  %v469_v8 = vld [vmem:[%s665_s3 + $0x8] sm:$0xff]   ;;  %v75_v9 = vsel %vm73_vm1, %v74_v6, 0 }
   0x3   :  { %410 = vmatprep.subr.bf16.mxu0 %v508_v1  ;;  %436 = vmatprep.mubr.msk.bf16.mxu1 %vm510_vm2, %v508_v1  ;;  %v77_v10 = vand.u32 %v467_v4, %v75_v9  ;;  %v28_v11 = vld [vmem:[%s662_s0] sm:$0x3]  ;;  %v470_v12 = vld [vmem:[%s665_s3 + $0x10] sm:$0xff]   ;;  %v471_v13 = vld [vmem:[%s665_s3 + $0x18] sm:$0xff]  }
   0x4   :  { %421 = vmatpush3.bf16.msra.mxu1 %v468_v7  ;;  %v29_v14 = vpack.c.bf16 %v28_v11, %v28_v11 }
   0x5   :  { %422 = vmatprep.subr.bf16.mxu1 %v508_v1 }
   0x6   :  { %411 = vmatpush3.bf16.msra.mxu0 %v465_v2 }
   0x7   :  { %412 = vmatprep.subr.bf16.mxu0 %v508_v1 }
   0x8   :  { %423 = vmatpush3.bf16.msra.mxu1 %v469_v8 }
   0x9   :  { %424 = vmatprep.subr.bf16.mxu1 %v508_v1 }
   0xa   :  { %413 = vmatpush3.bf16.msra.mxu0 %v466_v3 }
   0xb   :  { %414 = vmatprep.subr.bf16.mxu0 %v508_v1 }
   0xc   :  { %425 = vmatpush3.bf16.msra.mxu1 %v470_v12 }
   0xd   :  { %426 = vmatprep.subr.bf16.mxu1 %v508_v1 }
   0xe   :  { %415 = vmatpush3.bf16.msra.mxu0 %v77_v10 }
   0xf   :  { %440 = vmatprep.subr.bf16.mxu0 %v508_v1 }
  0x11   :  { %417 = vmatmul.mubr.msk.bf16.vlgmr.msra.gmra.mrb[0].mxu0 %vm68_vm3, %v29_v14 }
  0x12   :  { %12 = vsyncpa [#allocation3], 0  ;;  %427 = vmatpush3.bf16.msra.mxu1 %v471_v13  ;;  %v472_v15 = vld [vmem:[%s665_s3 + $0x20] sm:$0xff]   ;;  %456 = vmatprep.mubr.msk.bf16.mxu0 %vm510_vm2, %v508_v1  ;;  %v473_v16 = vld [vmem:[%s665_s3 + $0x28] sm:$0xff]   ;;  %s511_s20 = smov [#allocation2]   ;;  %vm345_vm4 = vcmask 189440  }
  0x13   :  { %428 = vmatprep.subr.bf16.mxu1 %v508_v1  ;;  %v474_v17 = vld [vmem:[%s665_s3 + $0x30] sm:$0xff]   ;;  %v475_v18 = vld [vmem:[%s665_s3 + $0x38] sm:$0xff]   ;;  %v476_v19 = vld [vmem:[%s667_s5] sm:$0xff]   ;;  %s353_s21 = sshll.u32 %s511_s20, 4  ;;  %s354_s21 = int_to_ptr.vmem [resolvable:$true] %s353_s21 }
  0x14   :  { %441 = vmatpush3.bf16.msra.mxu0 %v476_v19  ;;  %v477_v20 = vld [vmem:[%s667_s5 + $0x8] sm:$0xff]   ;;  %v478_v21 = vld [vmem:[%s667_s5 + $0x10] sm:$0xff]   ;;  %v479_v22 = vld [vmem:[%s667_s5 + $0x18] sm:$0xff]   ;;  %p489_p1 = scmp.lt.s32.totalorder %s354_s21, %s354_s21 }
  0x15   :  { %442 = vmatprep.subr.bf16.mxu0 %v508_v1  ;;  %v480_v23 = vld [vmem:[%s667_s5 + $0x20] sm:$0xff]   ;;  %v481_v24 = vld [vmem:[%s667_s5 + $0x28] sm:$0xff]   ;;  %v482_v33 = vld [vmem:[%s667_s5 + $0x30] sm:$0xff]  }
  0x16   :  { %429 = vmatpush3.bf16.msra.mxu1 %v472_v15  ;;  %v361_v25 = vld [vmem:[%s664_s2] ss:$0 sm:$0xff]  ;;  %v483_v34 = vld [vmem:[%s667_s5 + $0x38] sm:$0xff]  }
  0x17   :  { %430 = vmatprep.subr.bf16.mxu1 %v508_v1  ;;  %v367_v35 = vld [vmem:[%s666_s4] ss:$0 sm:$0xff]  ;;  %s484_s4 = scalar_lea.vmem %s354_s21, 32 }
  0x18   :  { %443 = vmatpush3.bf16.msra.mxu0 %v477_v20  ;;  %v376_v43 = vld [vmem:[%s668_s6] ss:$0 sm:$0xff]  ;;  %p485_p0 = scmp.ne.s32.totalorder %s354_s21, %s484_s4  ;;  %p490_p2 = scmp.lt.s32.totalorder %s484_s4, %s484_s4 }
  0x19   :  { %444 = vmatprep.subr.bf16.mxu0 %v508_v1 }
  0x1a   :  { %431 = vmatpush3.bf16.msra.mxu1 %v473_v16  ;;  %p491_p3 = por %p490_p2, %p489_p1 }
  0x1b   :  { %432 = vmatprep.subr.bf16.mxu1 %v508_v1 }
  0x1c   :  { %445 = vmatpush3.bf16.msra.mxu0 %v478_v21  ;;  %p492_p4 = pnand %p491_p3, %p485_p0 }
  0x1d   :  { %446 = vmatprep.subr.bf16.mxu0 %v508_v1 }
  0x1e   :  { %433 = vmatpush3.bf16.msra.mxu1 %v474_v17 }
  0x1f   :  { %434 = vmatprep.subr.bf16.mxu1 %v508_v1 }
  0x20   :  { %447 = vmatpush3.bf16.msra.mxu0 %v479_v22 }
  0x21   :  { %448 = vmatprep.subr.bf16.mxu0 %v508_v1 }
  0x22   :  { %435 = vmatpush3.bf16.msra.mxu1 %v475_v18 }
  0x24   :  { %449 = vmatpush3.bf16.msra.mxu0 %v480_v23 }
  0x25   :  { %450 = vmatprep.subr.bf16.mxu0 %v508_v1 }
  0x28   :  { %451 = vmatpush3.bf16.msra.mxu0 %v481_v24 }
  0x29   :  { %452 = vmatprep.subr.bf16.mxu0 %v508_v1 }
  0x2c   :  { %453 = vmatpush3.bf16.msra.mxu0 %v482_v33 }
  0x2d   :  { %454 = vmatprep.subr.bf16.mxu0 %v508_v1 }
  0x30   :  { %455 = vmatpush3.bf16.msra.mxu0 %v483_v34 }
  0xe4   :  { %v113_v26 = vpop.f32.mrb[0].mxu0 }
  0xe5   :  { %v114_v27 = vadd.f32 %v361_v25, %v113_v26  ;;  %v418_v28 = vpop.f32.mrb[1].mxu0 }
  0xe6   :  { %v116_v29 = vpop.f32.mrb[2].mxu0 }
  0xe7   :  { %v119_v30 = vmax.f32 %v114_v27, 0.0  ;;  %v419_v31 = vpop.f32.mrb[3].mxu0 }
  0xe9   :  { %v120_v32 = vpack.c.bf16 %v119_v30, %v119_v30 }
  0xeb   :  { %437 = vmatmul.mubr.bf16.vlgmr.msra.gmra.mrb[0].mxu1 %v120_v32 }
 0x1be   :  { %v226_v36 = vpop.f32.mrb[0].mxu1 }
 0x1bf   :  { %v227_v37 = vadd.f32 %v367_v35, %v226_v36  ;;  %v438_v38 = vpop.f32.mrb[1].mxu1 }
 0x1c0   :  { %v229_v39 = vpop.f32.mrb[2].mxu1 }
 0x1c1   :  { %v232_v40 = vmax.f32 %v227_v37, 0.0  ;;  %v439_v41 = vpop.f32.mrb[3].mxu1 }
 0x1c3   :  { %v233_v42 = vpack.c.bf16 %v232_v40, %v232_v40 }
 0x1c5   :  { %457 = vmatmul.mubr.bf16.vlgmr.msra.gmra.mrb[4].mxu0 %v233_v42 }
 0x298   :  { %v339_v44 = vpop.f32.mrb[4].mxu0 }
 0x299   :  { %v340_v45 = vadd.f32 %v376_v43, %v339_v44  ;;  %v458_v46 = vpop.f32.mrb[5].mxu0 }
 0x29a   :  { %v342_v47 = vpop.f32.mrb[6].mxu0 }
 0x29b   :  { %v459_v48 = vpop.f32.mrb[7].mxu0  ;;  %346 = vst.msk [vmem:[#allocation2] sm:$0x3] %vm345_vm4, %v340_v45 }
 0x29c   :  { %495 = shalt.err (!%p492_p4)
}
 0x29d   :  { %s496_s6 = scalar_lea.hbm %s669_s7, 32 }
 0x29e   :  { %p497_p5 = scmp.ne.s32.totalorder %s669_s7, %s496_s6  ;;  %p500_p6 = scmp.lt.u32.totalorder %s496_s6, %s669_s7 }
 0x2a0   :  { %p502_p7 = pnand %p500_p6, %p497_p5 }
 0x2a2   :  { %505 = shalt.err (!%p502_p7)
}
 0x2a3   :  { %356 = dma.vmem_to_hbm [thread:$0]  %s354_s21, 32, %s669_s7, [#allocation3]  }
 0x2a4   :  { %506 = dma.done.wait [#allocation3], 32  }
 0x2a5   :  { %507 = vsyncadd [#allocation3], 4294967264 }
 0x2a6   :  { %360 = vsyncpa [#allocation3], 1 }

</bundles_post_ra>
